<compile_context>
chip_gen: v5e
topology: v5e:2x2
jax: 0.10.0
libtpu: 0.0.40
codegen_flags: <defaults>
</compile_context>

<pallas_src>
import functools
import math

import jax
import jax.numpy as jnp
from jax.experimental import pallas as pl
from jax.experimental.pallas import tpu as pltpu


# ---------------------------------------------------------------------------
# Scheduler helpers (pure Python — cur_iter / cur_epoch are plain ints).
# ---------------------------------------------------------------------------
def _iter_per_epoch(total_data_num: int, batch_size: int) -> int:
    return int(math.ceil(total_data_num / batch_size))


def _total_training_iterations(total_data_num: int, batch_size: int, epochs: int) -> int:
    return _iter_per_epoch(total_data_num, batch_size) * epochs


def _cur_iteration(cur_iter: int, iter_per_epoch: int, cur_epoch: int) -> int:
    return cur_epoch * iter_per_epoch + cur_iter


def _cyclic_annealing_scheduler(iteration: int, total_iterations: int,
                                n_cycles: int = 4, ratio: float = 0.5) -> float:
    # TODO(synk): exact cyclic_annealing_scheduler source not shown; standard
    # linear cyclical annealing (Fu et al. 2019): n_cycles cycles, linear ramp
    # over the first `ratio` fraction of each cycle, then held at 1.0.
    period = max(float(total_iterations) / n_cycles, 1e-9)
    tau = (float(iteration) % period) / period
    return float(min(1.0, tau / ratio))


# ---------------------------------------------------------------------------
# Fused Pallas kernel: TB batch elements per grid step, shared accumulators.
# ---------------------------------------------------------------------------
def _vae_loss_kernel(*refs, use_bmm, has_latent, prior_mean, inv_prior_var,
                     log_prior_var, kl_beta, lat_beta, inv_n_recon, inv_n_kl,
                     inv_n_lat):
    refs = list(refs)
    acc_lat_ref = refs.pop() if has_latent else None   # VMEM latent-block f32 partial sums
    acc_recon_ref = refs.pop()                          # VMEM recon-block f32 partial sums
    out_ref = refs.pop()                                # VMEM (1,1) f32 final loss

    it = iter(refs)
    if use_bmm:
        reproj_ref = next(it)                 # (TB, P, L)
        z_ref = next(it)                      # (TB, L, Q)
        pred_recon_ref = None
    else:
        pred_recon_ref = next(it)             # (TB, P*Q) lane-dense
        z_ref = next(it) if has_latent else None   # (TB, L*Q) lane-dense
    tgt_recon_ref = next(it)                  # (TB, P, Q) or (TB, P*Q)
    tz_ref = next(it) if has_latent else None # (TB, L, Q) or (TB, L*Q)
    mean_ref = next(it)                       # (B, Zm) full array, fetched once
    std_ref = next(it)                        # (B, Zs) full array, fetched once

    step = pl.program_id(0)
    last = pl.num_programs(0) - 1

    @pl.when(step == 0)
    def _init():
        acc_recon_ref[...] = jnp.zeros_like(acc_recon_ref)
        if has_latent:
            acc_lat_ref[...] = jnp.zeros_like(acc_lat_ref)

    # ---- reconstruction term: batched matmul on the MXU (native-dtype
    # operands, f32 accumulation) + elementwise squared error accumulated into
    # a block-shaped f32 partial-sum buffer (pure VALU adds per step; no
    # per-step cross-lane reduce). Zero-padded batch rows contribute zero.
    if use_bmm:
        pred = jnp.einsum("bpl,blq->bpq", reproj_ref[...], z_ref[...],
                          preferred_element_type=jnp.float32)
    else:
        pred = pred_recon_ref[...].astype(jnp.float32)
    rdiff = pred - tgt_recon_ref[...].astype(jnp.float32)
    acc_recon_ref[...] = acc_recon_ref[...] + rdiff * rdiff

    # ---- optional true-latent-vector MSE partial sums ------------------------
    if has_latent:
        zdiff = z_ref[...].astype(jnp.float32) - tz_ref[...].astype(jnp.float32)
        acc_lat_ref[...] = acc_lat_ref[...] + zdiff * zdiff

    # ---- epilogue (runs ONCE): KL term from the full unpadded mean/std, one
    # cross-lane reduce per accumulator, one (1,1) store. ----------------------
    @pl.when(step == last)
    def _finalize():
        mu = mean_ref[...].astype(jnp.float32)
        std = std_ref[...].astype(jnp.float32)
        var = std * std
        dmu = mu - prior_mean
        # TODO(synk): KL_divergence_loss source not shown; analytic Gaussian KL
        # integrand, mean-reduced and scaled by beta (=0.5).
        kl_elem = (var + dmu * dmu) * inv_prior_var - 1.0 + log_prior_var - jnp.log(var)
        total = (jnp.sum(kl_elem) * (kl_beta * inv_n_kl)
                 + jnp.sum(acc_recon_ref[...]) * inv_n_recon)
        if has_latent:
            total = total + jnp.sum(acc_lat_ref[...]) * (lat_beta * inv_n_lat)
        out_ref[...] = jnp.zeros((1, 1), jnp.float32) + total


# ---------------------------------------------------------------------------
# Python wrapper mirroring the PyTorch module.
# ---------------------------------------------------------------------------
class VAELoss:
    # double-buffered input blocks + accumulators budget per grid step
    _VMEM_BLOCK_BUDGET = 24 * 1024 * 1024

    def __init__(self, total_data_num, batch_size, epochs,
                 prior_mean=0.0, prior_var=1.0, has_true_latent_vec=False):
        self.iter_per_epoch = _iter_per_epoch(total_data_num, batch_size)
        self.total_iterations = _total_training_iterations(total_data_num, batch_size, epochs)
        self.prior_mean = float(prior_mean)
        self.prior_var = float(prior_var)
        self.has_true_latent_vec = bool(has_true_latent_vec)

    def __call__(self, cur_iter, cur_epoch, target_recon, pred_mean, pred_std,
                 target_reprojection_tensor=None, pred_z=None, target_z=None,
                 pred_recon=None):
        iteration = _cur_iteration(cur_iter, self.iter_per_epoch, cur_epoch)
        beta = _cyclic_annealing_scheduler(iteration, self.total_iterations)

        use_bmm = (pred_recon is None) and (target_reprojection_tensor is not None)
        has_latent = self.has_true_latent_vec and (pred_z is not None) and (target_z is not None)
        if not use_bmm:
            assert pred_recon is not None, "need pred_recon or (reprojection tensor + pred_z)"

        B = int(target_recon.shape[0])

        # ---- batch-blocked inputs (order must match kernel unpack order) -----
        if use_bmm:
            batch_inputs = [target_reprojection_tensor, pred_z, target_recon]
            if has_latent:
                batch_inputs.append(target_z)
            recon_block_tail = tuple(target_recon.shape[1:])
            latent_block_tail = tuple(pred_z.shape[1:]) if has_latent else None
        else:
            pr = pred_recon.reshape(B, -1)
            tr = target_recon.reshape(B, -1)
            batch_inputs = [pr]
            if has_latent:
                batch_inputs.append(pred_z.reshape(B, -1))
            batch_inputs.append(tr)
            if has_latent:
                batch_inputs.append(target_z.reshape(B, -1))
            recon_block_tail = (tr.shape[1],)
            latent_block_tail = (int(pred_z.size // B),) if has_latent else None

        # ---- choose batch tile TB (single grid step when it all fits) --------
        per_elem = 0
        for x in batch_inputs:
            per_elem += 2 * (x.size // B) * x.dtype.itemsize   # double-buffered
        per_elem += 4 * (target_recon.size // B)                # recon accumulator
        if has_latent:
            per_elem += 4 * (pred_z.size // B)                  # latent accumulator

        if B * per_elem <= self._VMEM_BLOCK_BUDGET:
            TB = B
        else:
            TB = max(8, (self._VMEM_BLOCK_BUDGET // per_elem) // 8 * 8)
            TB = min(TB, B)
            # TODO(synk): if even TB=8 overshoots VMEM (huge per-element recon
            # tensors), add a second grid axis tiling the recon dimension.

        n_steps = -(-B // TB)
        Bpad = n_steps * TB
        if Bpad > B:
            pad = Bpad - B
            # zero padding contributes exactly 0 to both squared-error sums
            batch_inputs = [jnp.pad(x, ((0, pad),) + ((0, 0),) * (x.ndim - 1))
                            for x in batch_inputs]

        # mean/std passed un-padded as full-array (untiled) blocks; KL is
        # computed once in the epilogue.
        mean2 = pred_mean.reshape(B, -1)
        std2 = pred_std.reshape(B, -1)
        inputs = batch_inputs + [mean2, std2]

        def _batch_spec(x):
            tail = tuple(x.shape[1:])
            zeros = (0,) * len(tail)
            return pl.BlockSpec((TB,) + tail, lambda b, _z=zeros: (b,) + _z)

        def _full_spec(x):
            zeros = (0,) * x.ndim
            return pl.BlockSpec(tuple(x.shape), lambda b, _z=zeros: _z)

        in_specs = ([_batch_spec(x) for x in batch_inputs]
                    + [_full_spec(mean2), _full_spec(std2)])

        scratch = [pltpu.VMEM((TB,) + recon_block_tail, jnp.float32)]
        if has_latent:
            scratch.append(pltpu.VMEM((TB,) + latent_block_tail, jnp.float32))

        n_recon = float(target_recon.size)
        n_kl = float(pred_mean.size)
        n_lat = float(pred_z.size) if has_latent else 1.0

        kernel = functools.partial(
            _vae_loss_kernel,
            use_bmm=use_bmm,
            has_latent=has_latent,
            prior_mean=self.prior_mean,
            inv_prior_var=1.0 / self.prior_var,
            log_prior_var=math.log(self.prior_var),
            kl_beta=0.5,
            # TODO(synk): torch `mse_loss(pred_z, target_z, beta=beta)` source not
            # shown; interpreting beta as a scalar weight on the latent MSE term.
            lat_beta=beta,
            inv_n_recon=1.0 / n_recon,
            inv_n_kl=1.0 / n_kl,
            inv_n_lat=1.0 / n_lat,
        )

        loss = pl.pallas_call(
            kernel,
            out_shape=jax.ShapeDtypeStruct((1, 1), jnp.float32),
            grid_spec=pltpu.PrefetchScalarGridSpec(
                num_scalar_prefetch=0,
                grid=(n_steps,),
                in_specs=in_specs,
                out_specs=pl.BlockSpec((1, 1), lambda b: (0, 0)),
                scratch_shapes=scratch,
            ),
            compiler_params=pltpu.CompilerParams(
                # batch axis is a sequential reduction into shared accumulators
                dimension_semantics=("arbitrary",),
                # raise v5e's 16 MiB scoped default; stays under v7x's 64 MiB VMEM
                vmem_limit_bytes=48 * 1024 * 1024,
            ),
        )(*inputs)
        return loss  # (1, 1)


# ---------------------------------------------------------------------------
# Plain-JAX reference (sanity check in the demo).
# ---------------------------------------------------------------------------
def _vae_loss_ref(cur_iter, cur_epoch, target_recon, pred_mean, pred_std,
                  target_reprojection_tensor=None, pred_z=None, target_z=None,
                  pred_recon=None, *, total_data_num, batch_size, epochs,
                  prior_mean=0.0, prior_var=1.0, has_true_latent_vec=False):
    ipe = _iter_per_epoch(total_data_num, batch_size)
    tot = _total_training_iterations(total_data_num, batch_size, epochs)
    beta = _cyclic_annealing_scheduler(_cur_iteration(cur_iter, ipe, cur_epoch), tot)
    var = pred_std.astype(jnp.float32) ** 2
    dmu = pred_mean.astype(jnp.float32) - prior_mean
    kl = 0.5 * jnp.mean((var + dmu * dmu) / prior_var - 1.0
                        + math.log(prior_var) - jnp.log(var))
    if pred_recon is None and target_reprojection_tensor is not None:
        pred_recon = jnp.einsum("bpl,blq->bpq", target_reprojection_tensor, pred_z)
    recon = jnp.mean((pred_recon - target_recon) ** 2)
    loss = kl + recon
    if has_true_latent_vec and pred_z is not None and target_z is not None:
        loss = loss + beta * jnp.mean((pred_z - target_z) ** 2)
    return loss.reshape(1, 1)


if __name__ == "__main__":
    key = jax.random.PRNGKey(0)
    kr, kz, kt, km, ks, ktz = jax.random.split(key, 6)

    B, P, L, Q, Z = 2, 16, 32, 8, 32
    target_reprojection_tensor = jax.random.normal(kr, (B, P, L), jnp.float32)
    pred_z = jax.random.normal(kz, (B, L, Q), jnp.float32)
    target_recon = jax.random.normal(kt, (B, P, Q), jnp.float32)
    pred_mean = 0.1 * jax.random.normal(km, (B, Z), jnp.float32)
    pred_std = jax.random.uniform(ks, (B, Z), jnp.float32, minval=0.5, maxval=1.5)
    target_z = jax.random.normal(ktz, (B, L, Q), jnp.float32)

    cfg = dict(total_data_num=1000, batch_size=32, epochs=10,
               prior_mean=0.0, prior_var=1.0)

    # 1) default config (no true latent vec), reprojection bmm inside the kernel
    m1 = VAELoss(**cfg, has_true_latent_vec=False)
    loss1 = m1(3, 1, target_recon, pred_mean, pred_std,
               target_reprojection_tensor=target_reprojection_tensor, pred_z=pred_z)
    jax.block_until_ready(loss1)
    assert loss1.shape == (1, 1)
    ref1 = _vae_loss_ref(3, 1, target_recon, pred_mean, pred_std,
                         target_reprojection_tensor=target_reprojection_tensor,
                         pred_z=pred_z, **cfg, has_true_latent_vec=False)
    assert jnp.allclose(loss1, ref1, rtol=1e-3, atol=1e-3)

    # 2) with true latent supervision (exercises the annealing-weighted term)
    m2 = VAELoss(**cfg, has_true_latent_vec=True)
    loss2 = m2(3, 1, target_recon, pred_mean, pred_std,
               target_reprojection_tensor=target_reprojection_tensor,
               pred_z=pred_z, target_z=target_z)
    jax.block_until_ready(loss2)
    assert loss2.shape == (1, 1)
    ref2 = _vae_loss_ref(3, 1, target_recon, pred_mean, pred_std,
                         target_reprojection_tensor=target_reprojection_tensor,
                         pred_z=pred_z, target_z=target_z,
                         **cfg, has_true_latent_vec=True)
    assert jnp.allclose(loss2, ref2, rtol=1e-3, atol=1e-3)

    # 3) pred_recon supplied directly (no in-kernel bmm, lane-dense flat layout)
    pred_recon = jnp.einsum("bpl,blq->bpq", target_reprojection_tensor, pred_z)
    loss3 = m1(3, 1, target_recon, pred_mean, pred_std, pred_recon=pred_recon)
    jax.block_until_ready(loss3)
    assert loss3.shape == (1, 1)
    ref3 = _vae_loss_ref(3, 1, target_recon, pred_mean, pred_std,
                         pred_recon=pred_recon, **cfg, has_true_latent_vec=False)
    assert jnp.allclose(loss3, ref3, rtol=1e-3, atol=1e-3)

    print("KERNEL_OK")
</pallas_src>

<mosaic_0001>
module attributes {stable_mosaic.version = 11 : i64} {
  func.func @_vae_loss_kernel(%arg0: i32, %arg1: memref<2x16x32xf32, #tpu.memory_space<vmem>>, %arg2: memref<2x32x8xf32, #tpu.memory_space<vmem>>, %arg3: memref<2x16x8xf32, #tpu.memory_space<vmem>>, %arg4: memref<2x32xf32, #tpu.memory_space<vmem>>, %arg5: memref<2x32xf32, #tpu.memory_space<vmem>>, %arg6: memref<1x1xf32, #tpu.memory_space<vmem>>, %arg7: memref<2x16x8xf32, #tpu.memory_space<vmem>>) attributes {dimension_semantics = [#tpu.dimension_semantics<arbitrary>], iteration_bounds = array<i64: 1>, scalar_prefetch = 0 : i64, scratch_operands = 1 : i64, tpu.core_type = #tpu.core_type<tc>, window_params = [{transform_indices = @transform_0, window_bounds = array<i64: 2, 16, 32>}, {transform_indices = @transform_1, window_bounds = array<i64: 2, 32, 8>}, {transform_indices = @transform_2, window_bounds = array<i64: 2, 16, 8>}, {pipeline_mode = #tpu.pipeline_mode<synchronous>, transform_indices = @transform_3, window_bounds = array<i64: 2, 32>}, {pipeline_mode = #tpu.pipeline_mode<synchronous>, transform_indices = @transform_4, window_bounds = array<i64: 2, 32>}, {pipeline_mode = #tpu.pipeline_mode<synchronous>, transform_indices = @transform_5, window_bounds = array<i64: 1, 1>}]} {
    %c0_i32 = arith.constant 0 : i32
    %0 = arith.cmpi eq, %arg0, %c0_i32 : i32
    %1 = arith.extui %0 : i1 to i32
    %c0_i32_0 = arith.constant 0 : i32
    %2 = arith.cmpi ne, %1, %c0_i32_0 : i32
    scf.if %2 {
      %cst_17 = arith.constant 0.000000e+00 : f32
      %15 = vector.broadcast %cst_17 : f32 to vector<2x16x8xf32>
      %c0_18 = arith.constant 0 : index
      %c0_19 = arith.constant 0 : index
      %c0_20 = arith.constant 0 : index
      %16 = vector.load %arg7[%c0_18, %c0_19, %c0_20] : memref<2x16x8xf32, #tpu.memory_space<vmem>>, vector<2x16x8xf32>
      tpu.vector_store %arg7[%c0_18, %c0_19, %c0_20], %15 {strides = array<i32>} : memref<2x16x8xf32, #tpu.memory_space<vmem>>, vector<2x16x8xf32>,
    } else {
    }
    %c0 = arith.constant 0 : index
    %c0_1 = arith.constant 0 : index
    %c0_2 = arith.constant 0 : index
    %3 = vector.load %arg1[%c0, %c0_1, %c0_2] : memref<2x16x32xf32, #tpu.memory_space<vmem>>, vector<2x16x32xf32>
    %c0_3 = arith.constant 0 : index
    %c0_4 = arith.constant 0 : index
    %c0_5 = arith.constant 0 : index
    %4 = vector.load %arg2[%c0_3, %c0_4, %c0_5] : memref<2x32x8xf32, #tpu.memory_space<vmem>>, vector<2x32x8xf32>
    "tpu.trace_start"() <{level = 10 : i32, message = "bpl,blq->bpq"}> : () -> ()
    %cst = arith.constant dense<0.000000e+00> : vector<2x16x8xf32>
    %5 = tpu.matmul %3, %4, %cst {dimension_numbers = #tpu.dot_dimension_numbers<[2], [1], [1], [2], [0, 0, 0, 1, 1, 2], [0], [0]>} : vector<2x16x32xf32>, vector<2x32x8xf32>, vector<2x16x8xf32> -> vector<2x16x8xf32>
    "tpu.trace_stop"() : () -> ()
    %c0_6 = arith.constant 0 : index
    %c0_7 = arith.constant 0 : index
    %c0_8 = arith.constant 0 : index
    %6 = vector.load %arg3[%c0_6, %c0_7, %c0_8] : memref<2x16x8xf32, #tpu.memory_space<vmem>>, vector<2x16x8xf32>
    %7 = arith.subf %5, %6 : vector<2x16x8xf32>
    %c0_9 = arith.constant 0 : index
    %c0_10 = arith.constant 0 : index
    %c0_11 = arith.constant 0 : index
    %8 = vector.load %arg7[%c0_9, %c0_10, %c0_11] : memref<2x16x8xf32, #tpu.memory_space<vmem>>, vector<2x16x8xf32>
    %9 = arith.mulf %7, %7 : vector<2x16x8xf32>
    %10 = arith.addf %8, %9 : vector<2x16x8xf32>
    %c0_12 = arith.constant 0 : index
    %c0_13 = arith.constant 0 : index
    %c0_14 = arith.constant 0 : index
    %11 = vector.load %arg7[%c0_12, %c0_13, %c0_14] : memref<2x16x8xf32, #tpu.memory_space<vmem>>, vector<2x16x8xf32>
    tpu.vector_store %arg7[%c0_12, %c0_13, %c0_14], %10 {strides = array<i32>} : memref<2x16x8xf32, #tpu.memory_space<vmem>>, vector<2x16x8xf32>,
    %c0_i32_15 = arith.constant 0 : i32
    %12 = arith.cmpi eq, %arg0, %c0_i32_15 : i32
    %13 = arith.extui %12 : i1 to i32
    %c0_i32_16 = arith.constant 0 : i32
    %14 = arith.cmpi ne, %13, %c0_i32_16 : i32
    scf.if %14 {
      %c0_17 = arith.constant 0 : index
      %c0_18 = arith.constant 0 : index
      %15 = vector.load %arg4[%c0_17, %c0_18] : memref<2x32xf32, #tpu.memory_space<vmem>>, vector<2x32xf32>
      %c0_19 = arith.constant 0 : index
      %c0_20 = arith.constant 0 : index
      %16 = vector.load %arg5[%c0_19, %c0_20] : memref<2x32xf32, #tpu.memory_space<vmem>>, vector<2x32xf32>
      %17 = arith.mulf %16, %16 : vector<2x32xf32>
      %cst_21 = arith.constant 0.000000e+00 : f32
      %18 = vector.broadcast %cst_21 : f32 to vector<2x32xf32>
      %19 = arith.subf %15, %18 : vector<2x32xf32>
      %20 = arith.mulf %19, %19 : vector<2x32xf32>
      %21 = arith.addf %17, %20 : vector<2x32xf32>
      %cst_22 = arith.constant 1.000000e+00 : f32
      %22 = vector.broadcast %cst_22 : f32 to vector<2x32xf32>
      %23 = arith.mulf %21, %22 : vector<2x32xf32>
      %cst_23 = arith.constant 1.000000e+00 : f32
      %24 = vector.broadcast %cst_23 : f32 to vector<2x32xf32>
      %25 = arith.subf %23, %24 : vector<2x32xf32>
      %cst_24 = arith.constant 0.000000e+00 : f32
      %26 = vector.broadcast %cst_24 : f32 to vector<2x32xf32>
      %27 = arith.addf %25, %26 : vector<2x32xf32>
      %28 = math.log %17 : vector<2x32xf32>
      %29 = arith.subf %27, %28 : vector<2x32xf32>
      %30 = vector.shape_cast %29 : vector<2x32xf32> to vector<1x2x32xf32>
      %cst_25 = arith.constant dense<0.000000e+00> : vector<1xf32>
      %31 = vector.multi_reduction <add>, %30, %cst_25 [1, 2] : vector<1x2x32xf32> to vector<1xf32>
      %32 = vector.shape_cast %31 : vector<1xf32> to vector<1x1x1xf32>
      %33 = vector.extract %32[0, 0, 0] : f32 from vector<1x1x1xf32>
      %cst_26 = arith.constant 7.812500e-03 : f32
      %34 = arith.mulf %33, %cst_26 : f32
      %c0_27 = arith.constant 0 : index
      %c0_28 = arith.constant 0 : index
      %c0_29 = arith.constant 0 : index
      %35 = vector.load %arg7[%c0_27, %c0_28, %c0_29] : memref<2x16x8xf32, #tpu.memory_space<vmem>>, vector<2x16x8xf32>
      %36 = vector.shape_cast %35 : vector<2x16x8xf32> to vector<1x2x16x8xf32>
      %cst_30 = arith.constant dense<0.000000e+00> : vector<1xf32>
      %37 = vector.multi_reduction <add>, %36, %cst_30 [1, 2, 3] : vector<1x2x16x8xf32> to vector<1xf32>
      %38 = vector.shape_cast %37 : vector<1xf32> to vector<1x1x1x1xf32>
      %39 = vector.extract %38[0, 0, 0, 0] : f32 from vector<1x1x1x1xf32>
      %cst_31 = arith.constant 3.906250e-03 : f32
      %40 = arith.mulf %39, %cst_31 : f32
      %41 = arith.addf %34, %40 : f32
      %cst_32 = arith.constant 0.000000e+00 : f32
      %42 = vector.broadcast %cst_32 : f32 to vector<1x1xf32>
      %43 = vector.broadcast %41 : f32 to vector<1x1xf32>
      %44 = arith.addf %42, %43 : vector<1x1xf32>
      %c0_33 = arith.constant 0 : index
      %c0_34 = arith.constant 0 : index
      %45 = vector.load %arg6[%c0_33, %c0_34] : memref<1x1xf32, #tpu.memory_space<vmem>>, vector<1x1xf32>
      tpu.vector_store %arg6[%c0_33, %c0_34], %44 {strides = array<i32>} : memref<1x1xf32, #tpu.memory_space<vmem>>, vector<1x1xf32>,
    } else {
    }
    return
  }
  func.func @transform_0(%arg0: i32) -> (i32, i32, i32) {
    %c0_i32 = arith.constant 0 : i32
    %c0_i32_0 = arith.constant 0 : i32
    %c0_i32_1 = arith.constant 0 : i32
    return %arg0, %c0_i32, %c0_i32_0 : i32, i32, i32
  }
  func.func @transform_1(%arg0: i32) -> (i32, i32, i32) {
    %c0_i32 = arith.constant 0 : i32
    %c0_i32_0 = arith.constant 0 : i32
    %c0_i32_1 = arith.constant 0 : i32
    return %arg0, %c0_i32, %c0_i32_0 : i32, i32, i32
  }
  func.func @transform_2(%arg0: i32) -> (i32, i32, i32) {
    %c0_i32 = arith.constant 0 : i32
    %c0_i32_0 = arith.constant 0 : i32
    %c0_i32_1 = arith.constant 0 : i32
    return %arg0, %c0_i32, %c0_i32_0 : i32, i32, i32
  }
  func.func @transform_3(%arg0: i32) -> (i32, i32) {
    %c0_i32 = arith.constant 0 : i32
    %c0_i32_0 = arith.constant 0 : i32
    %c0_i32_1 = arith.constant 0 : i32
    return %c0_i32, %c0_i32_0 : i32, i32
  }
  func.func @transform_4(%arg0: i32) -> (i32, i32) {
    %c0_i32 = arith.constant 0 : i32
    %c0_i32_0 = arith.constant 0 : i32
    %c0_i32_1 = arith.constant 0 : i32
    return %c0_i32, %c0_i32_0 : i32, i32
  }
  func.func @transform_5(%arg0: i32) -> (i32, i32) {
    %c0_i32 = arith.constant 0 : i32
    %c0_i32_0 = arith.constant 0 : i32
    %c0_i32_1 = arith.constant 0 : i32
    return %c0_i32, %c0_i32_0 : i32, i32
  }
}

</mosaic_0001>

<bundles_post_ra>
// kernel: tpu_custom_call.1
= control target key start
LH: loop header
LB: loop body
LE: loop exit
PB: predicated region body
PF: predicated region fallthrough
CT: control target
= control target key end

     0   :  { %vm25_vm0 = vcmask 64512   ;;  %v240_v4 = vmov 0.0   ;;  %s341_s0 = inlined_call_operand.vmem [shape: f32[2,16,32], index: 0, kind: input, shape index: {}]   ;;  %s342_s1 = inlined_call_operand.vmem [shape: f32[2,32,8], index: 1, kind: input, shape index: {}]   ;;  %s343_s2 = inlined_call_operand.vmem [shape: f32[2,16,8], index: 2, kind: input, shape index: {}]   ;;  %s344_s3 = inlined_call_operand.vmem [shape: f32[2,32], index: 3, kind: input, shape index: {}]   ;;  %s345_s4 = inlined_call_operand.vmem [shape: f32[2,32], index: 4, kind: input, shape index: {}]   ;;  %s346_s5 = inlined_call_operand.hbm [shape: f32[1,1], index: 5, kind: output, shape index: {}]  }
   0x1   :  { %v37_v0 = vld [vmem:[%s342_s1 + $0x18] sm:$0xff]  ;;  %v36_v1 = vld [vmem:[%s342_s1 + $0x10] sm:$0xff]  ;;  %26 = vst.msk [vmem:[#allocation2] sm:$0xff] %vm25_vm0, %v240_v4  ;;  %v35_v5 = vld [vmem:[%s342_s1 + $0x8] sm:$0xff] }
   0x2   :  { %198 = vmatpush.msra.mxu2 %v37_v0  ;;  %v41_v2 = vld [vmem:[%s342_s1 + $0x38] sm:$0xff]  ;;  %61 = vmatpush.msra.mxu0 %v37_v0  ;;  %v40_v3 = vld [vmem:[%s342_s1 + $0x30] sm:$0xff]  ;;  %27 = vst.msk [vmem:[#allocation2 + $0x8] sm:$0xff] %vm25_vm0, %v240_v4  ;;  %v39_v6 = vld [vmem:[%s342_s1 + $0x28] sm:$0xff] }
   0x3   :  { %202 = vmatpush.msra.mxu3 %v41_v2  ;;  %90 = vmatpush.msra.mxu1 %v41_v2  ;;  %28 = vst.msk [vmem:[#allocation2 + $0x10] sm:$0xff] %vm25_vm0, %v240_v4  ;;  %v34_v7 = vld [vmem:[%s342_s1] sm:$0xff] }
   0x4   :  { %199 = vmatpush.msra.mxu2 %v36_v1  ;;  %62 = vmatpush.msra.mxu0 %v36_v1  ;;  %29 = vst.msk [vmem:[#allocation2 + $0x18] sm:$0xff] %vm25_vm0, %v240_v4 }
   0x5   :  { %203 = vmatpush.msra.mxu3 %v40_v3  ;;  %91 = vmatpush.msra.mxu1 %v40_v3 }
   0x6   :  { %10 = vsyncpa [#allocation4], 0  ;;  %200 = vmatpush.msra.mxu2 %v35_v5  ;;  %v31_v8 = vld [vmem:[%s341_s0 + $0x8] sm:$0xff]  ;;  %vm42_vm1 = vcmask 261120   ;;  %63 = vmatpush.msra.mxu0 %v35_v5  ;;  %v38_v9 = vld [vmem:[%s342_s1 + $0x20] sm:$0xff]  ;;  %vm139_vm2 = vcmask 254976  }
   0x7   :  { %204 = vmatpush.msra.mxu3 %v39_v6  ;;  %v33_v10 = vld [vmem:[%s341_s0 + $0x18] sm:$0xff]  ;;  %92 = vmatpush.msra.mxu1 %v39_v6  ;;  %v30_v11 = vld [vmem:[%s341_s0] sm:$0xff]  ;;  %v32_v12 = vld [vmem:[%s341_s0 + $0x10] sm:$0xff]  ;;  %s241_s25 = smov [#allocation3]   ;;  %s184_s7 = sshll.u32 %s346_s5, 4  ;;  %vm175_vm3 = vcmask 0   ;;  %s185_s7 = int_to_ptr.hbm [resolvable:$true] %s184_s7 }
   0x8   :  { %201 = vmatpush.msra.mxu2 %v34_v7  ;;  %64 = vmatpush.msra.mxu0 %v34_v7  ;;  %v130_v13 = vld [vmem:[%s345_s4] sm:$0x3]  ;;  %v103_v25 = vld [vmem:[%s343_s2 + $0x10] sm:$0xff]  ;;  %v102_v30 = vld [vmem:[%s343_s2 + $0x8] sm:$0xff]  ;;  %s182_s26 = sshll.u32 %s241_s25, 4  ;;  %s183_s26 = int_to_ptr.vmem [resolvable:$true] %s182_s26 }
   0x9   :  { %194 = vmatmul.msk.f32.vlgmr.msra.gmra.mxu2 %vm42_vm1, %v31_v8  ;;  %205 = vmatpush.msra.mxu3 %v38_v9  ;;  %v131_v14 = vmul.f32 %v130_v13, %v130_v13  ;;  %v129_v15 = vld [vmem:[%s344_s3] sm:$0x3]  ;;  %v104_v33 = vld [vmem:[%s343_s2 + $0x18] sm:$0xff]  ;;  %v110_v39 = vld [vmem:[#allocation2 + $0x8] sm:$0xff] }
   0xa   :  { %196 = vmatmul.msk.f32.vlgmr.msra.gmra.mxu3 %vm42_vm1, %v33_v10  ;;  %193 = vmatmul.msk.f32.vlgmr.msra.gmra.mxu0 %vm42_vm1, %v30_v11  ;;  %v132_v16 = vmul.f32 %v129_v15, %v129_v15  ;;  %v101_v23 = vld [vmem:[%s343_s2] sm:$0xff]  ;;  %v111_v32 = vld [vmem:[#allocation2 + $0x10] sm:$0xff] }
   0xb   :  { %93 = vmatpush.msra.mxu1 %v38_v9  ;;  %212 = vlog2.f32 %v131_v14  ;;  %v109_v27 = vld [vmem:[#allocation2] sm:$0xff]  ;;  %v112_v43 = vld [vmem:[#allocation2 + $0x18] sm:$0xff] }
   0xc   :  { %195 = vmatmul.msk.f32.vlgmr.msra.gmra.mxu1 %vm42_vm1, %v32_v12  ;;  %v133_v17 = vadd.f32 %v132_v16, %v131_v14 }
   0xe   :  { %v197_v19 = vadd.f32 -1.0, %v133_v17 }
  0x11   :  { %v213_v18 = vpop.eup %212 }
  0x12   :  { %v137_v20 = vmul.f32 0.6931472, %v213_v18 }
  0x14   :  { %v138_v21 = vsub.f32 %v197_v19, %v137_v20 }
  0x16   :  { %v140_v22 = vsel %vm139_vm2, %v138_v21, 0.0 }
  0x17   :  { %141 = vadd.xlane.f32.xlu0 %v140_v22 }
  0x87   :  { %v66_v24 = vpop.f32.mrf.mxu0 }
  0x88   :  { %v105_v26 = vsub.f32 %v66_v24, %v101_v23 }
  0x89   :  { %v95_v28 = vpop.f32.mrf.mxu1 }
  0x8a   :  { %v113_v29 = vmul.f32 %v105_v26, %v105_v26  ;;  %v107_v31 = vsub.f32 %v95_v28, %v103_v25  ;;  %v142_v58 = vpop.xlane.xlu0 %141 }
  0x8b   :  { %v143_v59 = vrot.slane %v142_v58, 4 }
  0x8c   :  { %v117_v34 = vadd.f32 %v113_v29, %v109_v27  ;;  %v69_v35 = vpop.f32.mrf.mxu2  ;;  %v115_v36 = vmul.f32 %v107_v31, %v107_v31 }
  0x8d   :  { %v106_v37 = vsub.f32 %v69_v35, %v102_v30  ;;  %v98_v38 = vpop.f32.mrf.mxu3  ;;  %v144_v60 = vadd.f32 %v143_v59, %v142_v58 }
  0x8e   :  { %122 = vst.msk [vmem:[#allocation2] sm:$0xff] %vm25_vm0, %v117_v34  ;;  %v119_v40 = vadd.f32 %v115_v36, %v111_v32  ;;  %v108_v41 = vsub.f32 %v98_v38, %v104_v33 }
  0x8f   :  { %v114_v42 = vmul.f32 %v106_v37, %v106_v37  ;;  %v145_v61 = vrot.slane %v144_v60, 2 }
  0x90   :  { %124 = vst.msk [vmem:[#allocation2 + $0x10] sm:$0xff] %vm25_vm0, %v119_v40  ;;  %v116_v44 = vmul.f32 %v108_v41, %v108_v41 }
  0x91   :  { %v118_v45 = vadd.f32 %v114_v42, %v110_v39  ;;  %v146_v62 = vadd.f32 %v145_v61, %v144_v60 }
  0x92   :  { %v120_v46 = vadd.f32 %v116_v44, %v112_v43 }
  0x93   :  { %123 = vst.msk [vmem:[#allocation2 + $0x8] sm:$0xff] %vm25_vm0, %v118_v45  ;;  %v147_v63 = vrot.slane %v146_v62, 1 }
  0x94   :  { %125 = vst.msk [vmem:[#allocation2 + $0x18] sm:$0xff] %vm25_vm0, %v120_v46 }
  0x95   :  { %v151_v47 = vld [vmem:[#allocation2] sm:$0xff]  ;;  %v148_v0 = vadd.f32 %v147_v63, %v146_v62 }
  0x96   :  { %v155_v49 = vsel %vm25_vm0, %v151_v47, 0.0 }
  0x97   :  { %v153_v48 = vld [vmem:[#allocation2 + $0x10] sm:$0xff]  ;;  %206 = vpush %v148_v0 }
  0x98   :  { %v158_v53 = vsel %vm25_vm0, %v153_v48, 0.0 }
  0x9a   :  { %v152_v50 = vld [vmem:[#allocation2 + $0x8] sm:$0xff] }
  0x9b   :  { %v154_v51 = vld [vmem:[#allocation2 + $0x18] sm:$0xff]  ;;  %v156_v52 = vsel %vm25_vm0, %v152_v50, 0.0 }
  0x9c   :  { %v157_v54 = vadd.f32 %v156_v52, %v155_v49  ;;  %v160_v55 = vsel %vm25_vm0, %v154_v51, 0.0 }
  0x9e   :  { %v159_v56 = vadd.f32 %v158_v53, %v157_v54 }
  0xa0   :  { %v161_v57 = vadd.f32 %v160_v55, %v159_v56 }
  0xa2   :  { %162 = vadd.xlane.f32.xlu0 %v161_v57 }
  0xc8   :  { %s207_s2 = spop %206 }
  0xc9   :  { %s150_s27 = smul.f32 0.0078125, %s207_s2 }
 0x115   :  { %v163_v1 = vpop.xlane.xlu0 %162 }
 0x116   :  { %v164_v2 = vrot.slane %v163_v1, 4 }
 0x118   :  { %v165_v3 = vadd.f32 %v164_v2, %v163_v1 }
 0x11a   :  { %v166_v4 = vrot.slane %v165_v3, 2 }
 0x11c   :  { %v167_v5 = vadd.f32 %v166_v4, %v165_v3 }
 0x11e   :  { %v168_v6 = vrot.slane %v167_v5, 1 }
 0x120   :  { %v169_v7 = vadd.f32 %v168_v6, %v167_v5 }
 0x122   :  { %208 = vpush %v169_v7 }
 0x153   :  { %s209_s28 = spop %208 }
 0x154   :  { %s171_s29 = smul.f32 0.00390625, %s209_s28 }
 0x156   :  { %s172_s8 = sadd.f32 %s171_s29, %s150_s27 }
 0x158   :  { %v173_v8 = vstv %s172_s8 }
 0x159   :  { %176 = vst.msk [vmem:[#allocation3] sm:$0x1] %vm175_vm3, %v173_v8 }
 0x15a   :  { %187 = dma.vmem_to_hbm [thread:$0]  %s183_s26, 16, %s185_s7, [#allocation4]  }
 0x15b   :  { %238 = dma.done.wait [#allocation4], 16  }
 0x15c   :  { %239 = vsyncadd [#allocation4], 4294967280 }
 0x15d   :  { %192 = vsyncpa [#allocation4], 1 }

</bundles_post_ra>
